<compile_context>
chip_gen: v7x
topology: tpu7x:2x2x1
jax: 0.10.0
libtpu: 0.0.40
codegen_flags: <defaults>
</compile_context>

<pallas_src>
import functools

import jax
import jax.numpy as jnp
from jax.experimental import pallas as pl
from jax.experimental.pallas import tpu as pltpu


def _round_up(x, m):
    return ((x + m - 1) // m) * m


def _mlp_kernel(x_ref, w1_ref, b1_ref, w2_ref, b2_ref, w3_ref, b3_ref, o_ref):
    # x_ref : (d_in, TB)  bf16 — batch on the lane axis
    # wN_ref: (out, in)   bf16 — PyTorch nn.Linear weight layout
    # bN_ref: (out, 1)    f32
    # o_ref : (d_out, TB) f32  — lane-dense stores
    x = x_ref[...]
    # Layer 0: Linear(4, 32)   + Layer 1: ReLU
    h = jnp.dot(w1_ref[...], x, preferred_element_type=jnp.float32)
    h = jnp.maximum(h + b1_ref[...], 0.0)
    # Layer 2: Linear(32, 32)  + Layer 3: ReLU
    h = jnp.dot(w2_ref[...], h.astype(jnp.bfloat16),
                preferred_element_type=jnp.float32)
    h = jnp.maximum(h + b2_ref[...], 0.0)
    # Layer 4: Linear(32, 2)
    y = jnp.dot(w3_ref[...], h.astype(jnp.bfloat16),
                preferred_element_type=jnp.float32)
    o_ref[...] = (y + b3_ref[...]).astype(o_ref.dtype)


@functools.partial(jax.jit, static_argnames=("block_b",))
def mlp_forward(x, w1, b1, w2, b2, w3, b3, block_b=1024):
    """Fused MLP forward.

    x  : (B, d_in)   activations
    wN : (out, in)   PyTorch nn.Linear weight layout
    bN : (out,)      PyTorch nn.Linear bias layout
    returns (B, d_out) in x.dtype
    """
    B, d_in = x.shape
    d_h1 = w1.shape[0]
    d_h2 = w2.shape[0]
    d_out = w3.shape[0]
    assert block_b % 128 == 0

    # Batch tile lives on the lane axis -> multiple of 128 (or the whole
    # padded batch for small B).
    TB = min(block_b, _round_up(B, 128))
    B_pad = _round_up(B, TB)

    # Layout plumbing + bf16 casts happen in the wrapper, not the kernel.
    x_t = jnp.pad(x.astype(jnp.bfloat16).T, ((0, 0), (0, B_pad - B)))
    w1b, w2b, w3b = (w.astype(jnp.bfloat16) for w in (w1, w2, w3))
    b1c = b1.reshape(d_h1, 1).astype(jnp.float32)
    b2c = b2.reshape(d_h2, 1).astype(jnp.float32)
    b3c = b3.reshape(d_out, 1).astype(jnp.float32)

    y_t = pl.pallas_call(
        _mlp_kernel,
        out_shape=jax.ShapeDtypeStruct((d_out, B_pad), jnp.float32),
        grid_spec=pltpu.PrefetchScalarGridSpec(
            num_scalar_prefetch=0,
            grid=(B_pad // TB,),
            in_specs=[
                pl.BlockSpec((d_in, TB), lambda i: (0, i)),     # x tile (streams)
                pl.BlockSpec((d_h1, d_in), lambda i: (0, 0)),   # W1 (resident)
                pl.BlockSpec((d_h1, 1), lambda i: (0, 0)),      # b1 (resident)
                pl.BlockSpec((d_h2, d_h1), lambda i: (0, 0)),   # W2 (resident)
                pl.BlockSpec((d_h2, 1), lambda i: (0, 0)),      # b2 (resident)
                pl.BlockSpec((d_out, d_h2), lambda i: (0, 0)),  # W3 (resident)
                pl.BlockSpec((d_out, 1), lambda i: (0, 0)),     # b3 (resident)
            ],
            out_specs=pl.BlockSpec((d_out, TB), lambda i: (0, i)),
        ),
        compiler_params=pltpu.CompilerParams(
            dimension_semantics=("parallel",)),
    )(x_t, w1b, b1c, w2b, b2c, w3b, b3c)

    return y_t[:, :B].T.astype(x.dtype)


def _init_linear(key, fan_in, fan_out, dtype=jnp.float32):
    # Mimics PyTorch nn.Linear default init: uniform +/- 1/sqrt(fan_in),
    # weight stored as (out, in), bias as (out,).
    kw, kb = jax.random.split(key)
    bound = 1.0 / float(fan_in) ** 0.5
    w = jax.random.uniform(kw, (fan_out, fan_in), dtype, -bound, bound)
    b = jax.random.uniform(kb, (fan_out,), dtype, -bound, bound)
    return w, b


def _reference_f32(x, w1, b1, w2, b2, w3, b3):
    h = jnp.maximum(x @ w1.T + b1, 0.0)
    h = jnp.maximum(h @ w2.T + b2, 0.0)
    return h @ w3.T + b3


def _reference_bf16(x, w1, b1, w2, b2, w3, b3):
    bf = jnp.bfloat16
    h = jnp.dot(x.astype(bf), w1.astype(bf).T,
                preferred_element_type=jnp.float32) + b1
    h = jnp.maximum(h, 0.0)
    h = jnp.dot(h.astype(bf), w2.astype(bf).T,
                preferred_element_type=jnp.float32) + b2
    h = jnp.maximum(h, 0.0)
    return jnp.dot(h.astype(bf), w3.astype(bf).T,
                   preferred_element_type=jnp.float32) + b3


if __name__ == "__main__":
    # Config implemented: "Linear:4*32->ReLU->Linear:32*32->ReLU->Linear:32*2"
    batch, d_in, d_hidden, d_out = 8, 4, 32, 2

    key = jax.random.PRNGKey(0)
    kx, k1, k2, k3 = jax.random.split(key, 4)

    x = jax.random.normal(kx, (batch, d_in), jnp.float32)
    w1, b1 = _init_linear(k1, d_in, d_hidden)
    w2, b2 = _init_linear(k2, d_hidden, d_hidden)
    w3, b3 = _init_linear(k3, d_hidden, d_out)

    out = mlp_forward(x, w1, b1, w2, b2, w3, b3)
    out = jax.block_until_ready(out)

    assert out.shape == (batch, d_out)
    # Tight check vs. a bf16-operand / f32-accumulation reference (same math).
    ref_bf16 = _reference_bf16(x, w1, b1, w2, b2, w3, b3)
    assert jnp.allclose(out, ref_bf16, atol=2e-3, rtol=2e-3), \
        "mismatch vs bf16 reference"
    # Loose semantic sanity check vs. the pure-f32 PyTorch-equivalent math.
    ref_f32 = _reference_f32(x, w1, b1, w2, b2, w3, b3)
    assert jnp.allclose(out, ref_f32, atol=1e-1, rtol=1e-1), \
        "mismatch vs f32 reference"

    print("KERNEL_OK")
</pallas_src>

<mosaic_0001>
module attributes {stable_mosaic.version = 11 : i64} {
  func.func @_mlp_kernel(%arg0: i32, %arg1: memref<4x128xbf16, #tpu.memory_space<vmem>>, %arg2: memref<32x4xbf16, #tpu.memory_space<vmem>>, %arg3: memref<32x1xf32, #tpu.memory_space<vmem>>, %arg4: memref<32x32xbf16, #tpu.memory_space<vmem>>, %arg5: memref<32x1xf32, #tpu.memory_space<vmem>>, %arg6: memref<2x32xbf16, #tpu.memory_space<vmem>>, %arg7: memref<2x1xf32, #tpu.memory_space<vmem>>, %arg8: memref<2x128xf32, #tpu.memory_space<vmem>>) attributes {dimension_semantics = [#tpu.dimension_semantics<parallel>], iteration_bounds = array<i64: 1>, scalar_prefetch = 0 : i64, scratch_operands = 0 : i64, tpu.core_type = #tpu.core_type<tc>, window_params = [{transform_indices = @transform_0, window_bounds = array<i64: 4, 128>}, {pipeline_mode = #tpu.pipeline_mode<synchronous>, transform_indices = @transform_1, window_bounds = array<i64: 32, 4>}, {pipeline_mode = #tpu.pipeline_mode<synchronous>, transform_indices = @transform_2, window_bounds = array<i64: 32, 1>}, {pipeline_mode = #tpu.pipeline_mode<synchronous>, transform_indices = @transform_3, window_bounds = array<i64: 32, 32>}, {pipeline_mode = #tpu.pipeline_mode<synchronous>, transform_indices = @transform_4, window_bounds = array<i64: 32, 1>}, {pipeline_mode = #tpu.pipeline_mode<synchronous>, transform_indices = @transform_5, window_bounds = array<i64: 2, 32>}, {pipeline_mode = #tpu.pipeline_mode<synchronous>, transform_indices = @transform_6, window_bounds = array<i64: 2, 1>}, {transform_indices = @transform_7, window_bounds = array<i64: 2, 128>}]} {
    %c0 = arith.constant 0 : index
    %c0_0 = arith.constant 0 : index
    %0 = vector.load %arg1[%c0, %c0_0] : memref<4x128xbf16, #tpu.memory_space<vmem>>, vector<4x128xbf16>
    %c0_1 = arith.constant 0 : index
    %c0_2 = arith.constant 0 : index
    %1 = vector.load %arg2[%c0_1, %c0_2] : memref<32x4xbf16, #tpu.memory_space<vmem>>, vector<32x4xbf16>
    %cst = arith.constant dense<0.000000e+00> : vector<32x128xf32>
    %2 = tpu.matmul %1, %0, %cst {dimension_numbers = #tpu.dot_dimension_numbers<[1], [0], [0], [1], [0, 0, 1, 1], [], []>} : vector<32x4xbf16>, vector<4x128xbf16>, vector<32x128xf32> -> vector<32x128xf32>
    %c0_3 = arith.constant 0 : index
    %c0_4 = arith.constant 0 : index
    %3 = vector.load %arg3[%c0_3, %c0_4] : memref<32x1xf32, #tpu.memory_space<vmem>>, vector<32x1xf32>
    %4 = vector.broadcast %3 : vector<32x1xf32> to vector<32x128xf32>
    %5 = arith.addf %2, %4 : vector<32x128xf32>
    %cst_5 = arith.constant 0.000000e+00 : f32
    %6 = vector.broadcast %cst_5 : f32 to vector<32x128xf32>
    %7 = arith.maximumf %5, %6 : vector<32x128xf32>
    %c0_6 = arith.constant 0 : index
    %c0_7 = arith.constant 0 : index
    %8 = vector.load %arg4[%c0_6, %c0_7] : memref<32x32xbf16, #tpu.memory_space<vmem>>, vector<32x32xbf16>
    %9 = arith.truncf %7 : vector<32x128xf32> to vector<32x128xbf16>
    %cst_8 = arith.constant dense<0.000000e+00> : vector<32x128xf32>
    %10 = tpu.matmul %8, %9, %cst_8 {dimension_numbers = #tpu.dot_dimension_numbers<[1], [0], [0], [1], [0, 0, 1, 1], [], []>} : vector<32x32xbf16>, vector<32x128xbf16>, vector<32x128xf32> -> vector<32x128xf32>
    %c0_9 = arith.constant 0 : index
    %c0_10 = arith.constant 0 : index
    %11 = vector.load %arg5[%c0_9, %c0_10] : memref<32x1xf32, #tpu.memory_space<vmem>>, vector<32x1xf32>
    %12 = vector.broadcast %11 : vector<32x1xf32> to vector<32x128xf32>
    %13 = arith.addf %10, %12 : vector<32x128xf32>
    %cst_11 = arith.constant 0.000000e+00 : f32
    %14 = vector.broadcast %cst_11 : f32 to vector<32x128xf32>
    %15 = arith.maximumf %13, %14 : vector<32x128xf32>
    %c0_12 = arith.constant 0 : index
    %c0_13 = arith.constant 0 : index
    %16 = vector.load %arg6[%c0_12, %c0_13] : memref<2x32xbf16, #tpu.memory_space<vmem>>, vector<2x32xbf16>
    %17 = arith.truncf %15 : vector<32x128xf32> to vector<32x128xbf16>
    %cst_14 = arith.constant dense<0.000000e+00> : vector<2x128xf32>
    %18 = tpu.matmul %16, %17, %cst_14 {dimension_numbers = #tpu.dot_dimension_numbers<[1], [0], [0], [1], [0, 0, 1, 1], [], []>} : vector<2x32xbf16>, vector<32x128xbf16>, vector<2x128xf32> -> vector<2x128xf32>
    %c0_15 = arith.constant 0 : index
    %c0_16 = arith.constant 0 : index
    %19 = vector.load %arg7[%c0_15, %c0_16] : memref<2x1xf32, #tpu.memory_space<vmem>>, vector<2x1xf32>
    %20 = vector.broadcast %19 : vector<2x1xf32> to vector<2x128xf32>
    %21 = arith.addf %18, %20 : vector<2x128xf32>
    %c0_17 = arith.constant 0 : index
    %c0_18 = arith.constant 0 : index
    %22 = vector.load %arg8[%c0_17, %c0_18] : memref<2x128xf32, #tpu.memory_space<vmem>>, vector<2x128xf32>
    tpu.vector_store %arg8[%c0_17, %c0_18], %21 {strides = array<i32>} : memref<2x128xf32, #tpu.memory_space<vmem>>, vector<2x128xf32>,
    return
  }
  func.func @transform_0(%arg0: i32) -> (i32, i32) {
    %c0_i32 = arith.constant 0 : i32
    %c0_i32_0 = arith.constant 0 : i32
    return %c0_i32, %arg0 : i32, i32
  }
  func.func @transform_1(%arg0: i32) -> (i32, i32) {
    %c0_i32 = arith.constant 0 : i32
    %c0_i32_0 = arith.constant 0 : i32
    %c0_i32_1 = arith.constant 0 : i32
    return %c0_i32, %c0_i32_0 : i32, i32
  }
  func.func @transform_2(%arg0: i32) -> (i32, i32) {
    %c0_i32 = arith.constant 0 : i32
    %c0_i32_0 = arith.constant 0 : i32
    %c0_i32_1 = arith.constant 0 : i32
    return %c0_i32, %c0_i32_0 : i32, i32
  }
  func.func @transform_3(%arg0: i32) -> (i32, i32) {
    %c0_i32 = arith.constant 0 : i32
    %c0_i32_0 = arith.constant 0 : i32
    %c0_i32_1 = arith.constant 0 : i32
    return %c0_i32, %c0_i32_0 : i32, i32
  }
  func.func @transform_4(%arg0: i32) -> (i32, i32) {
    %c0_i32 = arith.constant 0 : i32
    %c0_i32_0 = arith.constant 0 : i32
    %c0_i32_1 = arith.constant 0 : i32
    return %c0_i32, %c0_i32_0 : i32, i32
  }
  func.func @transform_5(%arg0: i32) -> (i32, i32) {
    %c0_i32 = arith.constant 0 : i32
    %c0_i32_0 = arith.constant 0 : i32
    %c0_i32_1 = arith.constant 0 : i32
    return %c0_i32, %c0_i32_0 : i32, i32
  }
  func.func @transform_6(%arg0: i32) -> (i32, i32) {
    %c0_i32 = arith.constant 0 : i32
    %c0_i32_0 = arith.constant 0 : i32
    %c0_i32_1 = arith.constant 0 : i32
    return %c0_i32, %c0_i32_0 : i32, i32
  }
  func.func @transform_7(%arg0: i32) -> (i32, i32) {
    %c0_i32 = arith.constant 0 : i32
    %c0_i32_0 = arith.constant 0 : i32
    return %c0_i32, %arg0 : i32, i32
  }
}

</mosaic_0001>

<bundles_post_ra>
// kernel: mlp_forward.1
= control target key start
LH: loop header
LB: loop body
LE: loop exit
PB: predicated region body
PF: predicated region fallthrough
CT: control target
= control target key end

     0   :  { %vm73_vm0 = vcmask 1041408   ;;  %vm66_vm1 = vcmask 31744   ;;  %v338_v1 = vmov 0   ;;  %vm170_vm2 = vcmask 261120   ;;  %s434_s0 = inlined_call_operand.vmem [shape: bf16[4,128], index: 0, kind: input, shape index: {}]   ;;  %s435_s1 = inlined_call_operand.vmem [shape: bf16[32,4], index: 1, kind: input, shape index: {}]   ;;  %s436_s2 = inlined_call_operand.vmem [shape: f32[32,1], index: 2, kind: input, shape index: {}]   ;;  %s437_s4 = inlined_call_operand.vmem [shape: f32[32,1], index: 4, kind: input, shape index: {}]   ;;  %s438_s6 = inlined_call_operand.vmem [shape: f32[2,1], index: 6, kind: input, shape index: {}]   ;;  %s439_s3 = inlined_call_operand.vmem [shape: bf16[32,32], index: 3, kind: input, shape index: {}]   ;;  %s440_s5 = inlined_call_operand.vmem [shape: bf16[2,32], index: 5, kind: input, shape index: {}]   ;;  %s441_s7 = inlined_call_operand.vmem [shape: f32[2,128], index: 7, kind: output, shape index: {}]  }
   0x1   :  { %v27_v0 = vld [vmem:[%s434_s0] sm:$0x3]  ;;  %332 = vset.pattern.permute.xlu0 %v338_v1  ;;  %333 = vset.pattern.permute.xlu1 %v338_v1  ;;  %v335_v4 = vld [vmem:[%s435_s1 + $0x8] sm:$0xff]   ;;  %v34_v6 = vld [vmem:[%s436_s2 + $0x10] sm:$0xff]  ;;  %v339_v34 = vmov 0.0   ;;  %vm340_vm3 = vmmov 0  }
   0x2   :  { %328 = vmatprep.subr.msk.bf16.mxu0 %vm73_vm0, %v27_v0  ;;  %v75_v2 = vsel %vm73_vm0, %v27_v0, 0  ;;  %v334_v3 = vld [vmem:[%s435_s1] sm:$0xff]   ;;  %v33_v7 = vld [vmem:[%s436_s2 + $0x8] sm:$0xff]  ;;  %48 = vperm.xlu1 %333, %v34_v6   ;;  %v35_v8 = vld [vmem:[%s436_s2 + $0x18] sm:$0xff] }
   0x3   :  { %307 = vmatpush3.bf16.msra.mxu0 %v75_v2  ;;  %v32_v5 = vld [vmem:[%s436_s2] sm:$0xff]  ;;  %308 = vmatprep.mubr.msk.bf16.mxu0 %vm66_vm1, %v334_v3  ;;  %v137_v10 = vld [vmem:[%s437_s4 + $0x8] sm:$0xff]  ;;  %v138_v11 = vld [vmem:[%s437_s4 + $0x10] sm:$0xff] }
   0x4   :  { %38 = vperm.xlu0 %332, %v32_v5   ;;  %v136_v9 = vld [vmem:[%s437_s4] sm:$0xff]  ;;  %v139_v12 = vld [vmem:[%s437_s4 + $0x18] sm:$0xff]  ;;  %v337_v33 = vld [vmem:[%s439_s3 + $0x8] sm:$0xff]   ;;  %320 = vmatprep.subr.bf16.mxu0 %v339_v34 }
   0x5   :  { %v233_v13 = vld [vmem:[%s438_s6] sm:$0x3] }
   0x6   :  { %309 = vmatmul.mubr.msk.bf16.vlgmr.msra.gmra.mrb[0].mxu0 %vm66_vm1, %v335_v4  ;;  %53 = vperm.xlu1 %333, %v35_v8   ;;  %v336_v14 = vld [vmem:[%s439_s3] sm:$0xff]  }
   0x7   :  { %316 = vmatprep.mubr.msk.bf16.mxu1 %vm170_vm2, %v336_v14  ;;  %324 = vmatprep.mubr.msk.bf16.mxu0 %vm340_vm3, %v339_v34  ;;  %v230_v53 = vld [vmem:[%s440_s5] sm:$0x1] }
   0x8   :  { %43 = vperm.xlu0 %332, %v33_v7  }
   0xa   :  { %147 = vperm.xlu1 %333, %v137_v10  }
   0xc   :  { %142 = vperm.xlu0 %332, %v136_v9  }
   0xe   :  { %157 = vperm.xlu1 %333, %v139_v12  }
  0x10   :  { %152 = vperm.xlu0 %332, %v138_v11  }
  0x14   :  { %236 = vperm.xlu0 %332, %v233_v13  }
  0x81   :  { %v49_v15 = vpop.permute.xlu1 %48 }
  0x83   :  { %v39_v16 = vpop.permute.xlu0 %38 }
  0x85   :  { %v54_v20 = vpop.permute.xlu1 %53 }
  0x87   :  { %v44_v23 = vpop.permute.xlu0 %43 }
  0x89   :  { %v148_v36 = vpop.permute.xlu1 %147 }
  0x8b   :  { %v143_v35 = vpop.permute.xlu0 %142 }
  0x8d   :  { %v158_v41 = vpop.permute.xlu1 %157 }
  0x8f   :  { %v153_v37 = vpop.permute.xlu0 %152 }
  0x93   :  { %v237_v54 = vpop.permute.xlu0 %236 }
  0xd9   :  { %v310_v17 = vpop.f32.mrb[0].mxu0 }
  0xda   :  { %v120_v18 = vadd.f32 %v310_v17, %v49_v15  ;;  %v111_v19 = vpop.f32.mrb[1].mxu0 }
  0xdb   :  { %v112_v21 = vadd.f32 %v111_v19, %v39_v16  ;;  %v311_v22 = vpop.f32.mrb[2].mxu0 }
  0xdc   :  { %v123_v24 = vadd.f32 %v311_v22, %v54_v20  ;;  %v114_v25 = vpop.f32.mrb[3].mxu0  ;;  %v128_v27 = vmax.f32 %v120_v18, 0.0 }
  0xdd   :  { %v115_v26 = vadd.f32 %v114_v25, %v44_v23  ;;  %v126_v29 = vmax.f32 %v112_v21, 0.0 }
  0xde   :  { %v129_v28 = vmax.f32 %v123_v24, 0.0 }
  0xdf   :  { %v127_v30 = vmax.f32 %v115_v26, 0.0 }
  0xe0   :  { %v135_v31 = vpack.c.bf16 %v129_v28, %v128_v27 }
  0xe1   :  { %v134_v32 = vpack.c.bf16 %v127_v30, %v126_v29 }
  0xe3   :  { %312 = vmatprep.subr.bf16.mxu1 %v134_v32 }
  0xe4   :  { %313 = vmatpush3.bf16.msra.mxu1 %v134_v32 }
  0xe5   :  { %314 = vmatprep.subr.bf16.mxu1 %v135_v31 }
  0xe8   :  { %315 = vmatpush3.bf16.msra.mxu1 %v135_v31 }
  0xeb   :  { %317 = vmatmul.mubr.msk.bf16.vlgmr.msra.gmra.mrb[0].mxu1 %vm170_vm2, %v337_v33 }
 0x1be   :  { %v318_v38 = vpop.f32.mrb[0].mxu1 }
 0x1bf   :  { %v220_v39 = vadd.f32 %v318_v38, %v153_v37  ;;  %v211_v40 = vpop.f32.mrb[1].mxu1 }
 0x1c0   :  { %v212_v42 = vadd.f32 %v211_v40, %v143_v35  ;;  %v319_v43 = vpop.f32.mrb[2].mxu1 }
 0x1c1   :  { %v223_v44 = vadd.f32 %v319_v43, %v158_v41  ;;  %v214_v45 = vpop.f32.mrb[3].mxu1  ;;  %v228_v47 = vmax.f32 %v220_v39, 0.0 }
 0x1c2   :  { %v215_v46 = vadd.f32 %v214_v45, %v148_v36  ;;  %v226_v49 = vmax.f32 %v212_v42, 0.0 }
 0x1c3   :  { %v229_v48 = vmax.f32 %v223_v44, 0.0 }
 0x1c4   :  { %v227_v50 = vmax.f32 %v215_v46, 0.0 }
 0x1c5   :  { %v232_v51 = vpack.c.bf16 %v229_v48, %v228_v47 }
 0x1c6   :  { %v231_v52 = vpack.c.bf16 %v227_v50, %v226_v49 }
 0x1c8   :  { %321 = vmatpush3.bf16.msra.mxu0 %v231_v52 }
 0x1c9   :  { %322 = vmatprep.subr.bf16.mxu0 %v339_v34 }
 0x1cc   :  { %323 = vmatpush3.bf16.msra.mxu0 %v232_v51 }
 0x1cf   :  { %325 = vmatmul.mubr.msk.bf16.vlgmr.msra.gmra.mrb[4].mxu0 %vm170_vm2, %v230_v53 }
 0x2a2   :  { %v276_v55 = vpop.f32.mrb[4].mxu0 }
 0x2a3   :  { %v277_v56 = vadd.f32 %v276_v55, %v237_v54  ;;  %v326_v57 = vpop.f32.mrb[5].mxu0 }
 0x2a4   :  { %v279_v58 = vpop.f32.mrb[6].mxu0 }
 0x2a5   :  { %282 = vst [vmem:[%s441_s7] sm:$0x3] %v277_v56  ;;  %v327_v59 = vpop.f32.mrb[7].mxu0 }

</bundles_post_ra>
